<compile_context>
chip_gen: v5e
topology: v5e:2x2
jax: 0.10.0
libtpu: 0.0.40
codegen_flags: <defaults>
</compile_context>

<pallas_src>
import functools

import jax
import jax.numpy as jnp
from jax import lax
from jax.experimental import pallas as pl
from jax.experimental.pallas import tpu as pltpu

EPS = 1e-8


def _round_up(x, m):
    return (x + m - 1) // m * m


def _vmem_budget_bytes():
    """~80% of per-core VMEM, device-aware (64 MiB/TC v7x, 128 MiB v5e/v6e)."""
    try:
        cap = pltpu.get_tpu_info().vmem_capacity_bytes
    except Exception:
        cap = 64 << 20  # conservative fallback = v7x per-TC size
    return int(cap * 0.8)


def prepare_params(gamma, w, b):
    """One-time (init-time) parameter prep.

    Pads K (dim) and Dout to multiples of 128 (lane-dense x / unmasked output
    stores / full MXU passes) and casts the weight to bf16 once, so the per-call
    wrapper does not re-read/re-write the weight on every invocation.
    """
    d_true, dout_true = w.shape
    dp = _round_up(d_true, 128)
    doutp = _round_up(dout_true, 128)
    gamma_p = jnp.pad(gamma.astype(jnp.float32), (0, dp - d_true)).reshape(1, dp)
    w_p = jnp.pad(w, ((0, dp - d_true), (0, doutp - dout_true))).astype(jnp.bfloat16)
    b_p = jnp.pad(b.astype(jnp.float32), (0, doutp - dout_true)).reshape(1, doutp)
    return gamma_p, w_p, b_p, d_true, dout_true


def _prenorm_linear_kernel(x_ref, g_ref, w_ref, b_ref, o_ref, *, inv_d):
    # x_ref: (TM, DP) f32, g_ref: (1, DP) f32, w_ref: (DP, TN) bf16,
    # b_ref: (1, TN) f32, o_ref: (TM, TN) out_dtype
    x = x_ref[...]
    # RMSNorm in f32. Zero-padded K lanes contribute nothing to the sum; divide
    # by the TRUE dim (not the padded DP) so the statistic matches the reference.
    ms = jnp.sum(x * x, axis=-1, keepdims=True) * inv_d
    inv = lax.rsqrt(ms + EPS)
    normed = x * inv * g_ref[...]
    # fn = Linear(dim -> dim_out): bf16 x bf16 -> f32 accumulate on the MXU.
    acc = jnp.dot(normed.astype(jnp.bfloat16), w_ref[...],
                  preferred_element_type=jnp.float32)
    o_ref[...] = (acc + b_ref[...]).astype(o_ref.dtype)


def prenorm_linear(x, params, *, tm=256, out_dtype=jnp.float32):
    """x: (B, S, D) f32; params from prepare_params. Returns (B, S, Dout)."""
    gamma_p, w_bf, b_p, d_true, dout_true = params
    B, S, D = x.shape
    assert D == d_true, "x feature dim must match the prepared parameters"
    DP = gamma_p.shape[1]
    DoutP = b_p.shape[1]
    M = B * S

    x2d = x.reshape(M, D).astype(jnp.float32)
    if DP != D:
        # Lane-dense K; zero lanes are harmless (sum + explicit divisor in kernel).
        x2d = jnp.pad(x2d, ((0, 0), (0, DP - D)))

    budget = _vmem_budget_bytes()
    out_bytes = jnp.dtype(out_dtype).itemsize

    # Row tile: multiple of 8 (f32 sublanes). No row padding; Pallas masks the
    # ragged last block under pl.cdiv.
    tm = min(tm, _round_up(M, 8))
    tm = max(8, _round_up(tm, 8))

    def footprint(tile_m, tile_n, w_bufs):
        return (2 * tile_m * DP * 4                 # x tile (double-buffered)
                + 2 * tile_m * tile_n * out_bytes   # out tile (double-buffered)
                + w_bufs * DP * tile_n * 2          # bf16 weight slab(s)
                + DP * 4 + 2 * DoutP * 4)           # gamma + bias

    # Prefer the fully-resident, single-buffered weight; otherwise add an N
    # grid axis over DoutP (TN multiple of 256 for v6e/v7x MXU columns) so only
    # a (DP, TN) slab is resident, shrinking tm if still over budget.
    if footprint(tm, DoutP, 1) <= budget:
        tn, n_tiles = DoutP, 1
    else:
        tn = 256 if DoutP % 256 == 0 else 128
        while footprint(tm, tn, 2) > budget and tm > 8:
            tm = max(8, tm // 2)
        n_tiles = DoutP // tn

    num_m = pl.cdiv(M, tm)

    if n_tiles == 1:
        grid = (num_m,)
        in_specs = [
            pl.BlockSpec((tm, DP), lambda i: (i, 0)),                                  # x: row-tiled
            pl.BlockSpec((1, DP), lambda i: (0, 0), pipeline_mode=pl.Buffered(1)),     # gamma: resident
            pl.BlockSpec((DP, DoutP), lambda i: (0, 0), pipeline_mode=pl.Buffered(1)), # W: resident bf16
            pl.BlockSpec((1, DoutP), lambda i: (0, 0), pipeline_mode=pl.Buffered(1)),  # b: resident
        ]
        out_specs = pl.BlockSpec((tm, DoutP), lambda i: (i, 0))
        dim_sem = ("parallel",)
    else:
        grid = (num_m, n_tiles)
        in_specs = [
            pl.BlockSpec((tm, DP), lambda i, j: (i, 0)),                               # x: constant over j
            pl.BlockSpec((1, DP), lambda i, j: (0, 0), pipeline_mode=pl.Buffered(1)),  # gamma: resident
            pl.BlockSpec((DP, tn), lambda i, j: (0, j)),                               # W slab: streamed over j
            pl.BlockSpec((1, tn), lambda i, j: (0, j)),                                # b slab
        ]
        out_specs = pl.BlockSpec((tm, tn), lambda i, j: (i, j))
        dim_sem = ("parallel", "arbitrary")

    est = footprint(tm, tn, 1 if n_tiles == 1 else 2)
    vmem_limit = min(budget, max(4 << 20, 2 * est))

    cost = pl.CostEstimate(
        flops=2 * M * DP * DoutP,
        bytes_accessed=4 * M * DP + out_bytes * M * DoutP + 2 * DP * DoutP,
        transcendentals=M * n_tiles,
    )

    kernel = functools.partial(_prenorm_linear_kernel, inv_d=1.0 / float(d_true))

    out2d = pl.pallas_call(
        kernel,
        out_shape=jax.ShapeDtypeStruct((M, DoutP), out_dtype),
        grid=grid,
        in_specs=in_specs,
        out_specs=out_specs,
        compiler_params=pltpu.CompilerParams(
            dimension_semantics=dim_sem,
            vmem_limit_bytes=vmem_limit,
        ),
        cost_estimate=cost,
    )(x2d, gamma_p, w_bf, b_p)

    if DoutP != dout_true:
        out2d = out2d[:, :dout_true]
    return out2d.reshape(B, S, dout_true)


def _reference(x, gamma, w, b):
    ms = jnp.mean(x * x, axis=-1, keepdims=True)
    normed = x * lax.rsqrt(ms + EPS) * gamma
    return normed @ w + b


if __name__ == "__main__":
    key = jax.random.PRNGKey(0)
    B, S, D, Dout = 2, 8, 32, 64

    k1, k2, k3 = jax.random.split(key, 3)
    x = jax.random.normal(k1, (B, S, D), dtype=jnp.float32)

    # Deterministic parameter init (synthetic, not a checkpoint load).
    gamma = jnp.ones((D,), dtype=jnp.float32)                       # RMSNorm.gamma = ones(dim)
    w = jax.random.normal(k2, (D, Dout), dtype=jnp.float32) * 0.05  # fn = Linear(dim, dim_out)
    b = jax.random.normal(k3, (Dout,), dtype=jnp.float32) * 0.01

    params = prepare_params(gamma, w, b)   # one-time init-side cast/pad

    out = prenorm_linear(x, params)
    out = jax.block_until_ready(out)

    ref = _reference(x, gamma, w, b)
    assert out.shape == (B, S, Dout)
    # bf16 matmul path: loosen tolerance vs. the f32 reference.
    assert jnp.allclose(out, ref, atol=3e-2, rtol=2e-2), "mismatch vs reference"

    print("KERNEL_OK")
</pallas_src>

<mosaic_0001>
module attributes {stable_mosaic.version = 11 : i64} {
  func.func @_prenorm_linear_kernel(%arg0: i32, %arg1: memref<16x128xf32, #tpu.memory_space<vmem>>, %arg2: memref<1x128xf32, #tpu.memory_space<vmem>>, %arg3: memref<128x128xbf16, #tpu.memory_space<vmem>>, %arg4: memref<1x128xf32, #tpu.memory_space<vmem>>, %arg5: memref<16x128xf32, #tpu.memory_space<vmem>>) attributes {dimension_semantics = [#tpu.dimension_semantics<parallel>], iteration_bounds = array<i64: 1>, scalar_prefetch = 0 : i64, scratch_operands = 0 : i64, tpu.core_type = #tpu.core_type<tc>, window_params = [{transform_indices = @transform_0, window_bounds = array<i64: 16, 128>}, {pipeline_mode = #tpu.pipeline_mode<synchronous>, transform_indices = @transform_1, window_bounds = array<i64: 1, 128>}, {pipeline_mode = #tpu.pipeline_mode<synchronous>, transform_indices = @transform_2, window_bounds = array<i64: 128, 128>}, {pipeline_mode = #tpu.pipeline_mode<synchronous>, transform_indices = @transform_3, window_bounds = array<i64: 1, 128>}, {transform_indices = @transform_4, window_bounds = array<i64: 16, 128>}]} {
    %c0 = arith.constant 0 : index
    %c0_0 = arith.constant 0 : index
    %0 = vector.load %arg1[%c0, %c0_0] : memref<16x128xf32, #tpu.memory_space<vmem>>, vector<16x128xf32>
    %1 = arith.mulf %0, %0 : vector<16x128xf32>
    %cst = arith.constant dense<0.000000e+00> : vector<16xf32>
    %2 = vector.multi_reduction <add>, %1, %cst [1] : vector<16x128xf32> to vector<16xf32>
    %3 = vector.shape_cast %2 : vector<16xf32> to vector<16x1xf32>
    %cst_1 = arith.constant 3.125000e-02 : f32
    %4 = vector.broadcast %cst_1 : f32 to vector<16x1xf32>
    %5 = arith.mulf %3, %4 : vector<16x1xf32>
    %cst_2 = arith.constant 9.99999993E-9 : f32
    %6 = vector.broadcast %cst_2 : f32 to vector<16x1xf32>
    %7 = arith.addf %5, %6 : vector<16x1xf32>
    %8 = math.rsqrt %7 : vector<16x1xf32>
    %9 = vector.broadcast %8 : vector<16x1xf32> to vector<16x128xf32>
    %10 = arith.mulf %0, %9 : vector<16x128xf32>
    %c0_3 = arith.constant 0 : index
    %c0_4 = arith.constant 0 : index
    %11 = vector.load %arg2[%c0_3, %c0_4] : memref<1x128xf32, #tpu.memory_space<vmem>>, vector<1x128xf32>
    %12 = vector.broadcast %11 : vector<1x128xf32> to vector<16x128xf32>
    %13 = arith.mulf %10, %12 : vector<16x128xf32>
    %14 = arith.truncf %13 : vector<16x128xf32> to vector<16x128xbf16>
    %c0_5 = arith.constant 0 : index
    %c0_6 = arith.constant 0 : index
    %15 = vector.load %arg3[%c0_5, %c0_6] : memref<128x128xbf16, #tpu.memory_space<vmem>>, vector<128x128xbf16>
    %cst_7 = arith.constant dense<0.000000e+00> : vector<16x128xf32>
    %16 = tpu.matmul %14, %15, %cst_7 {dimension_numbers = #tpu.dot_dimension_numbers<[1], [0], [0], [1], [0, 0, 1, 1], [], []>} : vector<16x128xbf16>, vector<128x128xbf16>, vector<16x128xf32> -> vector<16x128xf32>
    %c0_8 = arith.constant 0 : index
    %c0_9 = arith.constant 0 : index
    %17 = vector.load %arg4[%c0_8, %c0_9] : memref<1x128xf32, #tpu.memory_space<vmem>>, vector<1x128xf32>
    %18 = vector.broadcast %17 : vector<1x128xf32> to vector<16x128xf32>
    %19 = arith.addf %16, %18 : vector<16x128xf32>
    %c0_10 = arith.constant 0 : index
    %c0_11 = arith.constant 0 : index
    %20 = vector.load %arg5[%c0_10, %c0_11] : memref<16x128xf32, #tpu.memory_space<vmem>>, vector<16x128xf32>
    tpu.vector_store %arg5[%c0_10, %c0_11], %19 {strides = array<i32>} : memref<16x128xf32, #tpu.memory_space<vmem>>, vector<16x128xf32>,
    return
  }
  func.func @transform_0(%arg0: i32) -> (i32, i32) {
    %c0_i32 = arith.constant 0 : i32
    %c0_i32_0 = arith.constant 0 : i32
    return %arg0, %c0_i32 : i32, i32
  }
  func.func @transform_1(%arg0: i32) -> (i32, i32) {
    %c0_i32 = arith.constant 0 : i32
    %c0_i32_0 = arith.constant 0 : i32
    %c0_i32_1 = arith.constant 0 : i32
    return %c0_i32, %c0_i32_0 : i32, i32
  }
  func.func @transform_2(%arg0: i32) -> (i32, i32) {
    %c0_i32 = arith.constant 0 : i32
    %c0_i32_0 = arith.constant 0 : i32
    %c0_i32_1 = arith.constant 0 : i32
    return %c0_i32, %c0_i32_0 : i32, i32
  }
  func.func @transform_3(%arg0: i32) -> (i32, i32) {
    %c0_i32 = arith.constant 0 : i32
    %c0_i32_0 = arith.constant 0 : i32
    %c0_i32_1 = arith.constant 0 : i32
    return %c0_i32, %c0_i32_0 : i32, i32
  }
  func.func @transform_4(%arg0: i32) -> (i32, i32) {
    %c0_i32 = arith.constant 0 : i32
    %c0_i32_0 = arith.constant 0 : i32
    return %arg0, %c0_i32 : i32, i32
  }
}

</mosaic_0001>

<bundles_post_ra>
// kernel: tpu_custom_call.1
= control target key start
LH: loop header
LB: loop body
LE: loop exit
PB: predicated region body
PF: predicated region fallthrough
CT: control target
= control target key end

     0   :  { %9 = vsyncpa [#allocation3], 0  ;;  %s418_s0 = inlined_call_operand.hbm [shape: f32[16,128], index: 0, kind: input, shape index: {}]   ;;  %s419_s1 = inlined_call_operand.hbm [shape: f32[1,128], index: 1, kind: input, shape index: {}]   ;;  %s420_s2 = inlined_call_operand.hbm [shape: bf16[128,128], index: 2, kind: input, shape index: {}]   ;;  %s421_s3 = inlined_call_operand.vmem [shape: f32[1,128], index: 3, kind: input, shape index: {}]   ;;  %s422_s4 = inlined_call_operand.hbm [shape: f32[16,128], index: 4, kind: output, shape index: {}]  }
   0x1   :  { %10 = vsyncpa [#allocation6], 0  ;;  %s30_s17 = sshll.u32 %s419_s1, 4  ;;  %s31_s17 = int_to_ptr.hbm [resolvable:$true] %s30_s17 }
   0x2   :  { %11 = vsyncpa [#allocation4], 0  ;;  %s364_s18 = smov [#allocation5]   ;;  %s16_s22 = sshll.u32 %s418_s0, 4  ;;  %s17_s22 = int_to_ptr.hbm [resolvable:$true] %s16_s22 }
   0x3   :  { %s32_s19 = sshll.u32 %s364_s18, 4  ;;  %s365_s23 = smov [#allocation2]   ;;  %s33_s19 = int_to_ptr.vmem [resolvable:$true] %s32_s19 }
   0x4   :  { %35 = dma.hbm_to_vmem [thread:$0]  %s31_s17, 16, %s33_s19, [#allocation6]  }
   0x5   :  { %s18_s24 = sshll.u32 %s365_s23, 4  ;;  %s366_s25 = smov 128   ;;  %s19_s24 = int_to_ptr.vmem [resolvable:$true] %s18_s24 }
   0x6   :  { %s367_s26 = smov 8   ;;  %s40_s28 = sshll.u32 %s420_s2, 4  ;;  %s41_s28 = int_to_ptr.hbm [resolvable:$true] %s40_s28 }
   0x7   :  { %24 = dma.hbm_to_vmem [thread:$0]  %s17_s22, 256, %s19_s24, [#allocation3], %s366_s25, %s366_s25, %s367_s26  }
   0x8   :  { %s368_s29 = smov [#allocation7]   ;;  %s369_s0 = smov 64  }
   0x9   :  { %s42_s30 = sshll.u32 %s368_s29, 4  ;;  %s370_s5 = smov 4   ;;  %s43_s30 = int_to_ptr.vmem [resolvable:$true] %s42_s30 }
   0xa   :  { %48 = dma.hbm_to_vmem [thread:$0]  %s41_s28, 1024, %s43_s30, [#allocation6], %s369_s0, %s369_s0, %s370_s5  }
   0xb   :  { %358 = dma.done.wait [#allocation3], 256  }
   0xc   :  { %359 = vsyncadd [#allocation3], 4294967040 }
   0xd   :  { %360 = dma.done.wait [#allocation6], 1040  }
   0xe   :  { %361 = vsyncadd [#allocation6], 4294966256  ;;  %v63_v0 = vld [vmem:[#allocation2] sm:$0xff]  ;;  %v64_v2 = vld [vmem:[#allocation2 + $0x8] sm:$0xff]  ;;  %s371_s7 = smov [#allocation8]   ;;  %s194_s11 = sshll.u32 %s422_s4, 4  ;;  %s195_s11 = int_to_ptr.hbm [resolvable:$true] %s194_s11 }
   0xf   :  { %v65_v1 = vmul.f32 %v63_v0, %v63_v0  ;;  %v66_v3 = vmul.f32 %v64_v2, %v64_v2  ;;  %v247_v4 = vld [vmem:[#allocation7 + $0x38] sm:$0xff]  ;;  %v246_v5 = vld [vmem:[#allocation7 + $0x30] sm:$0xff]  ;;  %v245_v6 = vld [vmem:[#allocation7 + $0x28] sm:$0xff]  ;;  %s192_s8 = sshll.u32 %s371_s7, 4  ;;  %s193_s8 = int_to_ptr.vmem [resolvable:$true] %s192_s8 }
  0x10   :  { %172 = vmatpush.bf16.msra.mxu0 %v247_v4  ;;  %v244_v7 = vld [vmem:[#allocation7 + $0x20] sm:$0xff]  ;;  %v243_v8 = vld [vmem:[#allocation7 + $0x18] sm:$0xff]  ;;  %v242_v9 = vld [vmem:[#allocation7 + $0x10] sm:$0xff] }
  0x11   :  { %67 = vadd.xlane.f32.xlu0 %v65_v1  ;;  %v241_v10 = vld [vmem:[#allocation7 + $0x8] sm:$0xff]  ;;  %v240_v11 = vld [vmem:[#allocation7] sm:$0xff]  ;;  %v256_v32 = vld [vmem:[#allocation5] ss:$0 sm:$0xff] }
  0x12   :  { %v257_v38 = vld [vmem:[%s421_s3] ss:$0 sm:$0xff] }
  0x14   :  { %173 = vmatpush.bf16.msra.mxu0 %v246_v5 }
  0x18   :  { %174 = vmatpush.bf16.msra.mxu0 %v245_v6 }
  0x19   :  { %69 = vadd.xlane.f32.xlu0 %v66_v3 }
  0x1c   :  { %175 = vmatpush.bf16.msra.mxu0 %v244_v7 }
  0x20   :  { %176 = vmatpush.bf16.msra.mxu0 %v243_v8 }
  0x24   :  { %177 = vmatpush.bf16.msra.mxu0 %v242_v9 }
  0x28   :  { %178 = vmatpush.bf16.msra.mxu0 %v241_v10 }
  0x2c   :  { %179 = vmatpush.bf16.msra.mxu0 %v240_v11 }
  0x84   :  { %v68_v12 = vpop.xlane.xlu0 %67 }
  0x85   :  { %v71_v13 = vmul.f32 0.03125, %v68_v12 }
  0x87   :  { %v73_v14 = vadd.f32 1e-08, %v71_v13 }
  0x89   :  { %258 = vrsqrt.f32 %v73_v14  ;;  %vm81_vm1 = vweird.f32 %v73_v14 }
  0x8c   :  { %v70_v15 = vpop.xlane.xlu0 %69 }
  0x8d   :  { %v72_v16 = vmul.f32 0.03125, %v70_v15 }
  0x8f   :  { %v259_v17 = vpop.eup %258  ;;  %v74_v18 = vadd.f32 1e-08, %v72_v16 }
  0x90   :  { %v76_v19 = vmul.f32 %v259_v17, %v73_v14  ;;  %vm82_vm0 = vweird.f32 %v259_v17 }
  0x91   :  { %260 = vrsqrt.f32 %v74_v18  ;;  %vm83_vm2 = vmor %vm81_vm1, %vm82_vm0  ;;  %vm91_vm4 = vweird.f32 %v74_v18 }
  0x92   :  { %v77_v20 = vmul.f32 %v259_v17, %v76_v19 }
  0x94   :  { %v78_v21 = vmul.f32 0.5, %v77_v20 }
  0x96   :  { %v79_v22 = vsub.f32 1.5, %v78_v21 }
  0x97   :  { %v261_v23 = vpop.eup %260 }
  0x98   :  { %v86_v24 = vmul.f32 %v261_v23, %v74_v18  ;;  %v80_v25 = vmul.f32 %v259_v17, %v79_v22  ;;  %vm92_vm3 = vweird.f32 %v261_v23 }
  0x99   :  { %vm93_vm5 = vmor %vm91_vm4, %vm92_vm3 }
  0x9a   :  { %v87_v26 = vmul.f32 %v261_v23, %v86_v24  ;;  %v84_v29 = vsel %vm83_vm2, %v259_v17, %v80_v25 }
  0x9b   :  { %v95_v31 = vmul.f32 %v84_v29, %v63_v0 }
  0x9c   :  { %v88_v27 = vmul.f32 0.5, %v87_v26 }
  0x9d   :  { %v101_v35 = vmul.f32 %v256_v32, %v95_v31 }
  0x9e   :  { %v89_v28 = vsub.f32 1.5, %v88_v27 }
  0xa0   :  { %v90_v30 = vmul.f32 %v261_v23, %v89_v28 }
  0xa2   :  { %v94_v33 = vsel %vm93_vm5, %v261_v23, %v90_v30 }
  0xa3   :  { %v96_v34 = vmul.f32 %v94_v33, %v64_v2 }
  0xa5   :  { %v102_v36 = vmul.f32 %v256_v32, %v96_v34 }
  0xa7   :  { %v103_v37 = vpack.c.bf16 %v102_v36, %v101_v35 }
  0xa9   :  { %180 = vmatmul.bf16.vlgmr.msra.gmra.mxu0 %v103_v37 }
 0x126   :  { %v181_v39 = vpop.f32.mrf.mxu0 }
 0x127   :  { %v182_v40 = vadd.f32 %v257_v38, %v181_v39 }
 0x129   :  { %186 = vst [vmem:[#allocation8] sm:$0xff] %v182_v40 }
 0x12e   :  { %v183_v41 = vpop.f32.mrf.mxu0 }
 0x12f   :  { %v184_v42 = vadd.f32 %v257_v38, %v183_v41 }
 0x131   :  { %187 = vst [vmem:[#allocation8 + $0x8] sm:$0xff] %v184_v42 }
 0x132   :  { %200 = dma.vmem_to_hbm [thread:$0]  %s193_s8, 256, %s195_s11, [#allocation4], %s366_s25, %s366_s25, %s367_s26  }
 0x133   :  { %362 = dma.done.wait [#allocation4], 256  }
 0x134   :  { %363 = vsyncadd [#allocation4], 4294967040 }
 0x135   :  { %205 = vsyncpa [#allocation3], 1 }
 0x136   :  { %206 = vsyncpa [#allocation6], 1 }
 0x137   :  { %207 = vsyncpa [#allocation4], 1 }

</bundles_post_ra>
